<compile_context>
chip_gen: v7x
topology: tpu7x:2x2x1
jax: 0.10.0
libtpu: 0.0.40
codegen_flags: <defaults>
</compile_context>

<pallas_src>
import jax
import jax.numpy as jnp
from jax.experimental import pallas as pl
from jax.experimental.pallas import tpu as pltpu


# ---------------------------------------------------------------------------
# helpers
# ---------------------------------------------------------------------------

def _prod(xs):
    out = 1
    for v in xs:
        out *= v
    return out


def _split_view_dims(shape, dim):
    """Collapse `shape` around `dim` -> (P, size, T, dim) so that
    x.reshape(P, 2, size//2, T) is a free contiguous view with the split dim
    isolated away from the last-two (sublane/lane) positions."""
    dim = dim % len(shape)
    return _prod(shape[:dim]), shape[dim], _prod(shape[dim + 1:]), dim


def _pick_lane_tile(T, rows, itemsize, max_block_bytes=2 << 20):
    """Largest lane tile (multiple of 128 dividing T, or T itself) whose block
    (rows x tile) stays under max_block_bytes — sized for v7x's smaller VMEM
    while still amortizing per-grid-step overhead on v5e/v6e."""
    if rows * T * itemsize <= max_block_bytes:
        return T
    cap = (max_block_bytes // (rows * itemsize)) // 128 * 128
    t = max(cap, 128)
    while t >= 128:
        if T % t == 0:
            return t
        t -= 128
    return T  # no clean 128-multiple divisor; fall back to the full lane dim


def _chunk2_fallback(x, dim):
    # torch.chunk(x, 2, dim) with an odd size -> ragged (ceil, floor) halves.
    # TODO(synk): odd sizes never occur in ShuffleNetV2; served by plain XLA
    # slicing (not a Pallas kernel) purely for PyTorch-semantics parity.
    size = x.shape[dim]
    c0 = -(-size // 2)
    idx0 = [slice(None)] * x.ndim
    idx1 = [slice(None)] * x.ndim
    idx0[dim] = slice(0, c0)
    idx1[dim] = slice(c0, size)
    return x[tuple(idx0)], x[tuple(idx1)]


# ---------------------------------------------------------------------------
# kernels
# ---------------------------------------------------------------------------

def _split_both_kernel(x_ref, o0_ref, o1_ref):
    # x_ref: (2, half, t) — both halves of one leading-index slab; one HBM read,
    # two lane-dense writes.
    x = x_ref[...]
    o0_ref[...] = x[0]
    o1_ref[...] = x[1]


def _split_one_kernel(x_ref, o_ref):
    # The half was already selected by the input BlockSpec index_map; the kernel
    # is a pure lane-dense stream copy.
    o_ref[...] = x_ref[...]


def _half_conv1x1_bn_relu6_kernel(x_ref, w_ref, b_ref, o_ref):
    # x_ref: (c_in_half, t) — the channel half is selected by the input
    # index_map (no materialized HalfSplit).  1x1 conv == matmul over channels,
    # BN folded into (w_ref, b_ref), ReLU6 = clip(., 0, 6).
    y = jnp.dot(w_ref[...], x_ref[...], preferred_element_type=jnp.float32)
    y = y + b_ref[...]
    o_ref[...] = jnp.clip(y, 0.0, 6.0).astype(o_ref.dtype)


# ---------------------------------------------------------------------------
# wrappers
# ---------------------------------------------------------------------------

def channel_split(x, dim=1):
    """Pallas equivalent of (HalfSplit(dim, True)(x), HalfSplit(dim, False)(x))
    as used by ShuffleNetUnits(stride=1): both halves from a single pallas_call."""
    P, size, T, dim = _split_view_dims(x.shape, dim)
    if size % 2 != 0:
        return _chunk2_fallback(x, dim)
    h = size // 2
    xv = x.reshape(P, 2, h, T)
    t_tile = _pick_lane_tile(T, rows=2 * h, itemsize=x.dtype.itemsize)
    half_shape = tuple(h if ax == dim else s for ax, s in enumerate(x.shape))
    out_flat = jax.ShapeDtypeStruct((P, h, T), x.dtype)

    o0, o1 = pl.pallas_call(
        _split_both_kernel,
        out_shape=(out_flat, out_flat),
        grid=(P, T // t_tile),
        in_specs=[pl.BlockSpec((None, 2, h, t_tile), lambda p, t: (p, 0, 0, t))],
        out_specs=(pl.BlockSpec((None, h, t_tile), lambda p, t: (p, 0, t)),
                   pl.BlockSpec((None, h, t_tile), lambda p, t: (p, 0, t))),
        compiler_params=pltpu.CompilerParams(
            dimension_semantics=("parallel", "parallel")),
    )(xv)
    return o0.reshape(half_shape), o1.reshape(half_shape)


def half_split(x, dim=0, first_half=True):
    """Pallas equivalent of HalfSplit(dim, first_half)(x). Only the requested
    half is read/written; the half is chosen by the input BlockSpec index_map."""
    P, size, T, dim = _split_view_dims(x.shape, dim)
    if size % 2 != 0:
        first, second = _chunk2_fallback(x, dim)
        return first if first_half else second
    h = size // 2
    xv = x.reshape(P, 2, h, T)
    t_tile = _pick_lane_tile(T, rows=h, itemsize=x.dtype.itemsize)
    half_idx = 0 if first_half else 1
    half_shape = tuple(h if ax == dim else s for ax, s in enumerate(x.shape))

    out = pl.pallas_call(
        _split_one_kernel,
        out_shape=jax.ShapeDtypeStruct((P, h, T), x.dtype),
        grid=(P, T // t_tile),
        in_specs=[pl.BlockSpec((None, None, h, t_tile),
                               lambda p, t: (p, half_idx, 0, t))],
        out_specs=pl.BlockSpec((None, h, t_tile), lambda p, t: (p, 0, t)),
        compiler_params=pltpu.CompilerParams(
            dimension_semantics=("parallel", "parallel")),
    )(xv)
    return out.reshape(half_shape)


def fused_half_conv1x1_bn_relu6(x, w, b_conv, gamma, beta, mean, var,
                                eps=1e-5, first_half=True):
    """ShuffleNetUnits(stride=1) branch head: Conv1x1 + BatchNorm (inference,
    folded) + ReLU6 applied to one channel half of NCHW `x`, with the HalfSplit
    folded into the input BlockSpec index_map — zero-copy half selection."""
    N, C, H, W = x.shape
    assert C % 2 == 0, "channel split requires an even channel count"
    h = C // 2
    w2 = jnp.asarray(w, jnp.float32).reshape(-1, h)          # (C_out, C_in_half)
    c_out = w2.shape[0]
    scale = jnp.asarray(gamma, jnp.float32) / jnp.sqrt(
        jnp.asarray(var, jnp.float32) + eps)
    w_f = w2 * scale[:, None]
    b_f = ((jnp.asarray(b_conv, jnp.float32) - jnp.asarray(mean, jnp.float32))
           * scale + jnp.asarray(beta, jnp.float32)).reshape(c_out, 1)

    T = H * W
    xv = x.reshape(N, 2, h, T)
    t_tile = _pick_lane_tile(T, rows=max(h, c_out), itemsize=x.dtype.itemsize)
    half_idx = 0 if first_half else 1

    out = pl.pallas_call(
        _half_conv1x1_bn_relu6_kernel,
        out_shape=jax.ShapeDtypeStruct((N, c_out, T), x.dtype),
        grid=(N, T // t_tile),
        in_specs=[
            pl.BlockSpec((None, None, h, t_tile),
                         lambda n, t: (n, half_idx, 0, t)),
            pl.BlockSpec((c_out, h), lambda n, t: (0, 0)),
            pl.BlockSpec((c_out, 1), lambda n, t: (0, 0)),
        ],
        out_specs=pl.BlockSpec((None, c_out, t_tile), lambda n, t: (n, 0, t)),
        compiler_params=pltpu.CompilerParams(
            dimension_semantics=("parallel", "parallel")),
    )(xv, w_f, b_f)
    return out.reshape(N, c_out, H, W)


# ---------------------------------------------------------------------------
# self-test
# ---------------------------------------------------------------------------

if __name__ == "__main__":
    key = jax.random.PRNGKey(0)
    kx, kw, kb, kg, kbe, km, kv, ko = jax.random.split(key, 8)

    # Small NCHW input consistent with a ShuffleNetV2 stage (channel split on dim=1).
    N, C, H, W = 2, 16, 16, 16
    x = jax.random.normal(kx, (N, C, H, W), dtype=jnp.float32)
    h = C // 2

    # 1) Model path: both channel halves from ONE pallas_call.
    x1, x2 = channel_split(x, dim=1)
    jax.block_until_ready((x1, x2))
    assert x1.shape == (N, h, H, W) and x2.shape == (N, h, H, W)
    assert jnp.array_equal(x1, x[:, :h]) and jnp.array_equal(x2, x[:, h:])

    # 2) Module-default path (dim=0, single half) for API parity with HalfSplit().
    y1 = half_split(x, dim=0, first_half=True)
    y2 = half_split(x, dim=0, first_half=False)
    jax.block_until_ready((y1, y2))
    assert jnp.array_equal(y1, x[:1]) and jnp.array_equal(y2, x[1:])

    # 3) Split along one of the last two axes (handled via the lane-dense
    #    reshape, so no (8,128) BlockSpec violation).
    z1, z2 = channel_split(x, dim=2)
    jax.block_until_ready((z1, z2))
    assert jnp.array_equal(z1, x[:, :, :H // 2])
    assert jnp.array_equal(z2, x[:, :, H // 2:])

    # 4) Copy-eliminated consumer: Conv1x1 + BN + ReLU6 on the first half,
    #    half selected purely by the BlockSpec index_map.
    w = jax.random.normal(kw, (h, h, 1, 1), dtype=jnp.float32) * 0.2
    b_conv = jax.random.normal(kb, (h,), dtype=jnp.float32) * 0.1
    gamma = jax.random.uniform(kg, (h,), jnp.float32, 0.5, 1.5)
    beta = jax.random.normal(kbe, (h,), dtype=jnp.float32) * 0.1
    mean = jax.random.normal(km, (h,), dtype=jnp.float32) * 0.1
    var = jax.random.uniform(kv, (h,), jnp.float32, 0.5, 1.5)

    out = fused_half_conv1x1_bn_relu6(x, w, b_conv, gamma, beta, mean, var)
    jax.block_until_ready(out)

    xh = x[:, :h]
    ref = jnp.einsum("oi,nihw->nohw", w.reshape(h, h), xh)
    ref = ref + b_conv[None, :, None, None]
    ref = (ref - mean[None, :, None, None]) / jnp.sqrt(
        var[None, :, None, None] + 1e-5)
    ref = ref * gamma[None, :, None, None] + beta[None, :, None, None]
    ref = jnp.clip(ref, 0.0, 6.0)
    assert out.shape == (N, h, H, W)
    assert jnp.allclose(out, ref, rtol=1e-4, atol=1e-4)

    # 5) Odd split size: ragged torch.chunk semantics via the (non-Pallas) fallback.
    xo = jax.random.normal(ko, (2, 5, 4, 4), dtype=jnp.float32)
    o1 = half_split(xo, dim=1, first_half=True)
    o2 = half_split(xo, dim=1, first_half=False)
    assert o1.shape == (2, 3, 4, 4) and o2.shape == (2, 2, 4, 4)
    assert jnp.array_equal(o1, xo[:, :3]) and jnp.array_equal(o2, xo[:, 3:])

    print("KERNEL_OK")
</pallas_src>

<mosaic_0001>
module attributes {stable_mosaic.version = 11 : i64} {
  func.func @_split_both_kernel(%arg0: i32, %arg1: i32, %arg2: memref<1x2x8x256xf32, #tpu.memory_space<vmem>>, %arg3: memref<1x8x256xf32, #tpu.memory_space<vmem>>, %arg4: memref<1x8x256xf32, #tpu.memory_space<vmem>>) attributes {dimension_semantics = [#tpu.dimension_semantics<parallel>, #tpu.dimension_semantics<parallel>], iteration_bounds = array<i64: 2, 1>, scalar_prefetch = 0 : i64, scratch_operands = 0 : i64, tpu.core_type = #tpu.core_type<tc>, window_params = [{transform_indices = @transform_0, window_bounds = array<i64: 1, 2, 8, 256>}, {transform_indices = @transform_1, window_bounds = array<i64: 1, 8, 256>}, {transform_indices = @transform_2, window_bounds = array<i64: 1, 8, 256>}]} {
    %c0 = arith.constant 0 : index
    %c0_0 = arith.constant 0 : index
    %c0_1 = arith.constant 0 : index
    %c0_2 = arith.constant 0 : index
    %0 = vector.load %arg2[%c0, %c0_0, %c0_1, %c0_2] : memref<1x2x8x256xf32, #tpu.memory_space<vmem>>, vector<1x2x8x256xf32>
    %1 = vector.shape_cast %0 : vector<1x2x8x256xf32> to vector<2x8x256xf32>
    %2 = vector.extract_strided_slice %1 {offsets = [0, 0, 0], sizes = [1, 8, 256], strides = [1, 1, 1]} : vector<2x8x256xf32> to vector<1x8x256xf32>
    %3 = vector.shape_cast %2 : vector<1x8x256xf32> to vector<8x256xf32>
    %c0_3 = arith.constant 0 : index
    %c0_4 = arith.constant 0 : index
    %c0_5 = arith.constant 0 : index
    %4 = vector.load %arg3[%c0_3, %c0_4, %c0_5] : memref<1x8x256xf32, #tpu.memory_space<vmem>>, vector<1x8x256xf32>
    %5 = vector.shape_cast %4 : vector<1x8x256xf32> to vector<8x256xf32>
    %6 = vector.shape_cast %3 : vector<8x256xf32> to vector<1x8x256xf32>
    tpu.vector_store %arg3[%c0_3, %c0_4, %c0_5], %6 {strides = array<i32>} : memref<1x8x256xf32, #tpu.memory_space<vmem>>, vector<1x8x256xf32>,
    %7 = vector.extract_strided_slice %1 {offsets = [1, 0, 0], sizes = [1, 8, 256], strides = [1, 1, 1]} : vector<2x8x256xf32> to vector<1x8x256xf32>
    %8 = vector.shape_cast %7 : vector<1x8x256xf32> to vector<8x256xf32>
    %c0_6 = arith.constant 0 : index
    %c0_7 = arith.constant 0 : index
    %c0_8 = arith.constant 0 : index
    %9 = vector.load %arg4[%c0_6, %c0_7, %c0_8] : memref<1x8x256xf32, #tpu.memory_space<vmem>>, vector<1x8x256xf32>
    %10 = vector.shape_cast %9 : vector<1x8x256xf32> to vector<8x256xf32>
    %11 = vector.shape_cast %8 : vector<8x256xf32> to vector<1x8x256xf32>
    tpu.vector_store %arg4[%c0_6, %c0_7, %c0_8], %11 {strides = array<i32>} : memref<1x8x256xf32, #tpu.memory_space<vmem>>, vector<1x8x256xf32>,
    return
  }
  func.func @transform_0(%arg0: i32, %arg1: i32) -> (i32, i32, i32, i32) {
    %c0_i32 = arith.constant 0 : i32
    %c0_i32_0 = arith.constant 0 : i32
    %c0_i32_1 = arith.constant 0 : i32
    return %arg0, %c0_i32, %c0_i32_0, %arg1 : i32, i32, i32, i32
  }
  func.func @transform_1(%arg0: i32, %arg1: i32) -> (i32, i32, i32) {
    %c0_i32 = arith.constant 0 : i32
    %c0_i32_0 = arith.constant 0 : i32
    return %arg0, %c0_i32, %arg1 : i32, i32, i32
  }
  func.func @transform_2(%arg0: i32, %arg1: i32) -> (i32, i32, i32) {
    %c0_i32 = arith.constant 0 : i32
    %c0_i32_0 = arith.constant 0 : i32
    return %arg0, %c0_i32, %arg1 : i32, i32, i32
  }
}

</mosaic_0001>

<bundles_post_ra>
// kernel: tpu_custom_call.1
= control target key start
LH: loop header
LB: loop body
LE: loop exit
PB: predicated region body
PF: predicated region fallthrough
CT: control target
= control target key end

     0   :  { %8 = vsyncpa [#allocation3], 0  ;;  %s821_s0 = inlined_call_operand.hbm [shape: f32[2,2,8,256], index: 0, kind: input, shape index: {}]   ;;  %s822_s1 = inlined_call_operand.hbm [shape: f32[2,8,256], index: 1, kind: output, shape index: {0}]   ;;  %s823_s2 = inlined_call_operand.hbm [shape: f32[2,8,256], index: 2, kind: output, shape index: {1}]  }
   0x1   :  { %10 = vsyncpa [#allocation3 + $0x1], 0 }
   0x2   :  { %11 = vsyncpa [#allocation4], 0 }
   0x3   :  { %13 = vsyncpa [#allocation4 + $0x1], 0 }
   0x4   :  { %14 = vsyncpa [#allocation7], 0 }
   0x5   :  { %16 = vsyncpa [#allocation7 + $0x1], 0  ;;  %s618_s9 = smov 0   ;;  %s620_s10 = smov 0  }
   0x6   :  { %s622_s11 = smov 0   ;;  %s624_s12 = smov 0  }
   0x7   :  { %s626_s13 = smov 0   ;;  %s628_s14 = smov 0  }
   0x8 LB: > { %s361_s15 = sadd.s32 4294967295, %s596_s14   ;;  %s362_s16 = sadd.s32 4294967294, %s596_s14   ;;  %s596_s14 = sphi %s628_s14, %s22_s14   ;;  %s592_s13 = sphi %s626_s13, %s838_s13   ;;  %s588_s12 = sphi %s624_s12, %s837_s12   ;;  %s584_s11 = sphi %s622_s11, %s836_s11   ;;  %s580_s10 = sphi %s620_s10, %s835_s10   ;;  %s576_s9 = sphi %s618_s9, %s834_s9  }
   0x9   : > { %s34_s17 = sadd.s32 1, %s592_s13  ;;  %s43_s18 = sadd.s32 1, %s584_s11 }
   0xa   : > { %p36_p0 = scmp.ge.s32.totalorder %s34_s17, 2  ;;  %p50_p1 = scmp.ne.s32.totalorder %s584_s11, %s580_s10 }
   0xb   : > { %p51_p2 = scmp.eq.s32.totalorder %s596_s14, 0  ;;  %p56_p3 = scmp.ne.s32.totalorder %s580_s10, %s576_s9 }
   0xc   : > { %s840_s17 = smov (%p36_p0, %s34_s17), 0  ;;  %p57_p5 = scmp.eq.s32.totalorder %s361_s15, 0 }
   0xd   : > { %p659_p4 = por %p51_p2, %p50_p1  ;;  %s38_s20 = ssub.s32 %s592_s13, %s840_s17 }
   0xe   : > { %p82_p6 = scmp.eq.s32.totalorder %s361_s15, 1  ;;  %p41_p7 = scmp.eq.s32.totalorder %s38_s20, 0 }
   0xf   : > { %p665_p8 = por %p57_p5, %p56_p3  ;;  %p88_p10 = scmp.eq.s32.totalorder %s362_s16, 1 }
  0x10   : > { %p669_p9 = por %p82_p6, %p50_p1  ;;  %p400_p13 = scmp.lt.s32.totalorder %s596_s14, 2 }
  0x11   : > { %s674_s23 = scalar_select %p41_p7, %s584_s11, %s43_s18  }
  0x12   : > { %s827_s22 = scalar_select %p669_p9, 1, 0 }
  0x13   : > { %p676_p11 = por %p88_p10, %p56_p3  ;;  %s136_s25 = sand.u32 1, %s584_s11  }
  0x14   : > { %s365_s26 = sshll.u32 %s136_s25, 5  ;;  %s380_s27 = sshll.u32 %s592_s13, 9 }
  0x15   : > { %s828_s24 = scalar_select %p676_p11, 1, 0 }
  0x16   : > { %s687_s30 = scalar_lea.hbm %s821_s0, %s380_s27  ;;  %s140_s3 = scalar_lea.vmem [#allocation2], %s365_s26 }
  0x17   : > { %s149_s4 = sshll.u32 %s140_s3, 4  ;;  %p693_p0 = pnand %p400_p13, %p659_p4  ;;  %s689_s4 = int_to_ptr.vmem [resolvable:$true] %s149_s4 }
  0x18   : > { %s698_s6 = scalar_lea.sflag [#allocation3], %s136_s25  ;;  %s452_s7 = scalar_lea.hbm %s687_s30, 512 }
  0x19   : > { %p453_p2 = scmp.ne.s32.totalorder %s687_s30, %s452_s7  ;;  %p454_p3 = pneg %p693_p0 }
  0x1a   : > { %s457_s16 = scalar_lea.hbm %s821_s0, 1024  ;;  %p458_p4 = scmp.lt.u32.totalorder %s687_s30, %s821_s0 }
  0x1b   : > { %p455_p5 = pnand %p454_p3, %p453_p2  ;;  %p459_p7 = scmp.lt.u32.totalorder %s457_s16, %s452_s7 }
  0x1c   : > { %p461_p13 = scmp.lt.u32.totalorder %s452_s7, %s687_s30 }
  0x1d   : > { %p456_p6 = pneg %p455_p5  ;;  %p460_p10 = por %p459_p7, %p458_p4 }
  0x1f   : > { %p462_p12 = por %p461_p13, %p460_p10 }
  0x21   : > { %p463_p1 = pnand %p462_p12, %p456_p6 }
  0x23   : > { %466 = shalt.err (!%p463_p1)
}
  0x24   : > { %s467_s20 = scalar_lea.vmem %s689_s4, 512  ;;  %s598_s25 = smov [#allocation2]  }
  0x25   : > { %p468_p2 = scmp.ne.s32.totalorder %s689_s4, %s467_s20  ;;  %s472_s26 = sshll.u32 %s598_s25, 4  ;;  %s473_s26 = int_to_ptr.vmem [resolvable:$false] %s472_s26 }
  0x26   : > { %s474_s27 = scalar_lea.vmem %s473_s26, 1024  ;;  %p475_p9 = scmp.lt.s32.totalorder %s689_s4, %s473_s26 }
  0x27   : > { %p470_p5 = pnand %p468_p2, %p454_p3  ;;  %p476_p4 = scmp.lt.s32.totalorder %s474_s27, %s467_s20 }
  0x29   : > { %p471_p11 = pneg %p470_p5  ;;  %p477_p7 = por %p476_p4, %p475_p9 }
  0x2b   : > { %p478_p10 = pnand %p477_p7, %p471_p11 }
  0x2d   : > { %481 = shalt.err (!%p478_p10)
}
  0x2e   : > { %s599_s28 = smov 256   ;;  %s600_s29 = smov 16  }
  0x2f   : > { %392 = dma.hbm_to_vmem [thread:$0]  (!%p693_p0), %s687_s30, 512, %s689_s4, %s698_s6, %s599_s28, %s599_s28, %s600_s29  }
  0x30   : > { %p157_p12 = scmp.lt.s32.totalorder %s596_s14, 3  ;;  %p830_p1 = scmp.ge.s32.totalorder %s596_s14, 1 }
  0x32   : > { %p158_p3 = pnand %p830_p1, %p157_p12 }
  0x33   : > { %s730_s3 = sand.u32 (!%p158_p3), 1, %s580_s10  }
  0x34   : > { %161 = sbr.rel (%p158_p3) target bundleno = 111 (0x6f), region = 24  ;;  %s369_s7 = sshll.u32 (!%p158_p3), %s730_s3, 5 }
  0x35   : > { %s164_s8 = scalar_lea.sflag (!%p158_p3), [#allocation3], %s730_s3  ;;  %s167_s15 = scalar_lea.vmem (!%p158_p3), [#allocation2], %s369_s7 }
  0x3b   : > { %563 = dma.done.wait (%p665_p8), %s164_s8, 512  }
  0x3c   : > { %565 = vsyncadd (%p665_p8), %s164_s8, 4294966784  ;;  %s370_s30 = sshll.u32 %s730_s3, 4  ;;  %s381_s18 = sshll.u32 %s588_s12, 8  ;;  %v196_v0 = vld [vmem:[%s167_s15] sm:$0xff]  ;;  %v197_v1 = vld [vmem:[%s167_s15 + $0x8] sm:$0xff] }
  0x3d   : > { %s185_s4 = scalar_lea.vmem [#allocation5], %s370_s30  ;;  %s192_s6 = scalar_lea.vmem [#allocation6], %s370_s30  ;;  %v198_v2 = vld [vmem:[%s167_s15 + $0x10] sm:$0xff]  ;;  %v199_v3 = vld [vmem:[%s167_s15 + $0x18] sm:$0xff] }
  0x3e   : > { %s226_s5 = sshll.u32 %s185_s4, 4  ;;  %s242_s16 = sshll.u32 %s192_s6, 4  ;;  %200 = vst [vmem:[%s185_s4] sm:$0xff] %v196_v0  ;;  %201 = vst [vmem:[%s185_s4 + $0x8] sm:$0xff] %v197_v1  ;;  %s740_s5 = int_to_ptr.vmem [resolvable:$true] %s226_s5  ;;  %s742_s16 = int_to_ptr.vmem [resolvable:$true] %s242_s16 }
  0x3f   : > { %s747_s21 = scalar_lea.hbm %s822_s1, %s381_s18  ;;  %s752_s12 = scalar_lea.hbm %s823_s2, %s381_s18  ;;  %202 = vst [vmem:[%s192_s6] sm:$0xff] %v198_v2  ;;  %203 = vst [vmem:[%s192_s6 + $0x8] sm:$0xff] %v199_v3 }
  0x40   : > { %s205_s27 = scalar_lea.sflag [#allocation4], %s730_s3  ;;  %s482_s28 = scalar_lea.vmem %s740_s5, 256 }
  0x41   : > { %p483_p8 = scmp.ne.s32.totalorder %s740_s5, %s482_s28  ;;  %p831_p9 = scmp.ne.s32.totalorder %s827_s22, 0 }
  0x42   : > { %s601_s29 = smov [#allocation5]  }
  0x43   : > { %p484_p11 = pnand %p483_p8, %p831_p9  ;;  %s486_s7 = sshll.u32 %s601_s29, 4  ;;  %s487_s7 = int_to_ptr.vmem [resolvable:$false] %s486_s7 }
  0x44   : > { %s488_s8 = scalar_lea.vmem %s487_s7, 512  ;;  %p489_p6 = scmp.lt.s32.totalorder %s740_s5, %s487_s7 }
  0x45   : > { %p485_p0 = pneg %p484_p11  ;;  %p490_p13 = scmp.lt.s32.totalorder %s488_s8, %s482_s28 }
  0x47   : > { %p491_p2 = por %p490_p13, %p489_p6 }
  0x49   : > { %p492_p5 = pnand %p491_p2, %p485_p0 }
  0x4b   : > { %495 = shalt.err (!%p492_p5)
}
  0x4c   : > { %s496_s15 = scalar_lea.hbm %s747_s21, 256  ;;  %s500_s6 = scalar_lea.hbm %s822_s1, 512 }
  0x4d   : > { %p497_p4 = scmp.ne.s32.totalorder %s747_s21, %s496_s15  ;;  %p501_p12 = scmp.lt.u32.totalorder %s747_s21, %s822_s1 }
  0x4e   : > { %p502_p1 = scmp.lt.u32.totalorder %s500_s6, %s496_s15  ;;  %p504_p8 = scmp.lt.u32.totalorder %s496_s15, %s747_s21 }
  0x4f   : > { %p498_p7 = pnand %p497_p4, %p831_p9 }
  0x50   : > { %p503_p3 = por %p502_p1, %p501_p12 }
  0x51   : > { %p499_p10 = pneg %p498_p7 }
  0x52   : > { %p505_p11 = por %p504_p8, %p503_p3 }
  0x54   : > { %p506_p0 = pnand %p505_p11, %p499_p10 }
  0x56   : > { %509 = shalt.err (!%p506_p0)
}
  0x57   : > { %385 = dma.vmem_to_hbm [thread:$0]  (%p831_p9), %s740_s5, 256, %s747_s21, %s205_s27  }
  0x58   : > { %s210_s20 = scalar_lea.sflag [#allocation7], %s730_s3  ;;  %s510_s25 = scalar_lea.vmem %s742_s16, 256 }
  0x59   : > { %p511_p6 = scmp.ne.s32.totalorder %s742_s16, %s510_s25  ;;  %s602_s26 = smov [#allocation6]  }
  0x5a   : > { %s514_s28 = sshll.u32 %s602_s26, 4  ;;  %s515_s28 = int_to_ptr.vmem [resolvable:$false] %s514_s28 }
  0x5b   : > { %p512_p13 = pnand %p511_p6, %p831_p9  ;;  %s516_s29 = scalar_lea.vmem %s515_s28, 512 }
  0x5c   : > { %p517_p5 = scmp.lt.s32.totalorder %s742_s16, %s515_s28  ;;  %p518_p4 = scmp.lt.s32.totalorder %s516_s29, %s510_s25 }
  0x5d   : > { %p513_p2 = pneg %p512_p13 }
  0x5e   : > { %p519_p7 = por %p518_p4, %p517_p5 }
  0x60   : > { %p520_p10 = pnand %p519_p7, %p513_p2 }
  0x62   : > { %523 = shalt.err (!%p520_p10)
}
  0x63   : > { %s524_s3 = scalar_lea.hbm %s752_s12, 256  ;;  %s528_s27 = scalar_lea.hbm %s823_s2, 512 }
  0x64   : > { %p525_p12 = scmp.ne.s32.totalorder %s752_s12, %s524_s3  ;;  %p529_p8 = scmp.lt.u32.totalorder %s752_s12, %s823_s2 }
  0x65   : > { %p530_p11 = scmp.lt.u32.totalorder %s528_s27, %s524_s3  ;;  %p532_p6 = scmp.lt.u32.totalorder %s524_s3, %s752_s12 }
  0x66   : > { %p526_p1 = pnand %p525_p12, %p831_p9 }
  0x67   : > { %p531_p0 = por %p530_p11, %p529_p8 }
  0x68   : > { %p527_p3 = pneg %p526_p1 }
  0x69   : > { %p533_p13 = por %p532_p6, %p531_p0 }
  0x6b   : > { %p534_p2 = pnand %p533_p13, %p527_p3 }
  0x6d   : > { %537 = shalt.err (!%p534_p2)
}
  0x6e   : > { %386 = dma.vmem_to_hbm [thread:$0]  (%p831_p9), %s742_s16, 256, %s752_s12, %s210_s20  }
  0x6f PF: > { %s254_s15 = sand.u32 1, %s576_s9   ;;  %p832_p5 = scmp.ne.s32.totalorder %s828_s24, 0 }
  0x70   : > { %p833_p4 = scmp.ge.s32.totalorder %s596_s14, 2  ;;  %s255_s30 = scalar_lea.sflag [#allocation4], %s254_s15 }
  0x72   : > { %p394_p7 = pnand %p833_p4, %p832_p5 }
  0x74   : > { %567 = dma.done.wait (!%p394_p7), %s255_s30, 256  }
  0x75   : > { %569 = vsyncadd (!%p394_p7), %s255_s30, 4294967040  ;;  %s264_s4 = scalar_lea.sflag [#allocation7], %s254_s15 }
  0x76   : > { %571 = dma.done.wait (!%p394_p7), %s264_s4, 256  }
  0x77   : > { %573 = vsyncadd (!%p394_p7), %s264_s4, 4294967040  ;;  %s22_s14 = sadd.s32 1, %s596_s14   ;;  %s834_s9 = smov %s580_s10 }
  0x78   : > { %p19_p10 = scmp.ge.s32.totalorder %s22_s14, 4   ;;  %s835_s10 = smov %s584_s11 }
  0x79   : > { %s836_s11 = smov %s674_s23  ;;  %s837_s12 = smov %s592_s13 }
  0x7a   : > { %s838_s13 = smov %s840_s17  ;;  %21 = sbr.rel (!%p19_p10) target bundleno = 8 (0x8), region = 86 }
  0x81   :  { %269 = vsyncpa [#allocation3], 1 }
  0x82   :  { %271 = vsyncpa [#allocation3 + $0x1], 1 }
  0x83   :  { %272 = vsyncpa [#allocation4], 1 }
  0x84   :  { %274 = vsyncpa [#allocation4 + $0x1], 1 }
  0x85   :  { %275 = vsyncpa [#allocation7], 1 }
  0x86   :  { %277 = vsyncpa [#allocation7 + $0x1], 1 }

</bundles_post_ra>
